<compile_context>
chip_gen: v6e
topology: v6e:2x2x1
jax: 0.10.0
libtpu: 0.0.40
codegen_flags: <defaults>
</compile_context>

<pallas_src>
import functools

import jax
import jax.numpy as jnp
from jax.experimental import pallas as pl
from jax.experimental.pallas import tpu as pltpu


def _round_up(x: int, m: int) -> int:
    return (x + m - 1) // m * m


def _pick_tile(total: int, max_tile: int):
    """Pick a lane-tile for a length-`total` axis.

    Returns (tile, padded_total). Prefers (a) a single full-extent tile (legal
    for any size), then (b) a multiple-of-128 tile dividing `total` (no pad),
    and only falls back to padding when neither is possible.
    """
    if total <= max_tile:
        return total, total
    cap = max(128, (max_tile // 128) * 128)
    t = cap
    while t >= 128:
        if total % t == 0:
            return t, total
        t -= 128
    return cap, _round_up(total, cap)


# --------------------------------------------------------------------------- #
# Kernel 1 (fused): depth prediction (1x1 conv C->1) + background_setting +   #
#   depth-map encoder (1x1 conv 1->HID, ReLU, global mean pool, linear->CD)   #
#   + the c-dependent decoder hidden bias hc_b = wc^T c + bh.                  #
#   The depth map and per-pixel features stay entirely in VMEM.               #
# --------------------------------------------------------------------------- #
def _make_fused_depth_encoder_kernel(n_chan: int, inv_hw: float, n_pad: int):
    def kernel(x_ref, m_ref, wd_ref, bd_ref, w1_ref, b1_ref,
               w2_ref, b2_ref, wcT_ref, bh_ref,
               c_ref, hcb_ref, acc_ref):
        t = pl.program_id(1)

        @pl.when(t == 0)
        def _init():
            acc_ref[...] = jnp.zeros_like(acc_ref)

        x = x_ref[0].astype(jnp.float32)               # (C, TILE) pixels on lanes
        # depth = sum_c wd[c] * x[c, :] + bd  (C unrolled: pure VPU, lane-dense)
        depth = x[0:1, :] * wd_ref[0]
        for cc in range(1, n_chan):
            depth = depth + x[cc:cc + 1, :] * wd_ref[cc]
        depth = (depth + bd_ref[0]) * m_ref[0].astype(jnp.float32)  # bg_setting v=0

        # per-pixel encoder features; reduce over lanes immediately so the
        # running accumulator is only (HID, 1) (no HIDxTILE RMW per tile)
        feat = jnp.maximum(w1_ref[...] * depth + b1_ref[...], 0.0)  # (HID, TILE)
        acc_ref[...] += jnp.sum(feat, axis=1, keepdims=True)        # (HID, 1)

        @pl.when(t == pl.num_programs(1) - 1)
        def _finalize():
            pooled = acc_ref[...]
            if n_pad:  # padded pixels (x=0, mask=0) each contribute relu(b1)
                pooled = pooled - jnp.maximum(b1_ref[...], 0.0) * float(n_pad)
            pooled = pooled * inv_hw                                 # (HID, 1)
            c_val = (jnp.sum(w2_ref[...] * pooled, axis=0, keepdims=True)
                     + b2_ref[...])                                  # (1, CD)
            c_ref[...] = c_val[None]                                 # (1, 1, CD)
            hcb = (jnp.sum(wcT_ref[...] * c_val, axis=1, keepdims=True)
                   + bh_ref[...])                                    # (HID, 1)
            hcb_ref[...] = hcb[None]                                 # (1, HID, 1)

    return kernel


def depth_encode(inputs_nchw, gt_mask_nchw, params, *, max_tile_hw=16384):
    """inputs (B,C,H,W), gt_mask (B,1,H,W) -> (c (B,CD), hc_b (B,HID,1))."""
    B, C, H, W = inputs_nchw.shape
    HW = H * W
    x = inputs_nchw.reshape(B, C, HW)                   # contiguous NCHW reshape
    m = gt_mask_nchw.reshape(B, 1, HW).astype(jnp.float32)

    TILE, HWp = _pick_tile(HW, max_tile_hw)
    n_tiles = HWp // TILE
    n_pad = HWp - HW
    if n_pad:
        x = jnp.pad(x, ((0, 0), (0, 0), (0, n_pad)))
        m = jnp.pad(m, ((0, 0), (0, 0), (0, n_pad)))

    wd = params["wd"].reshape(C).astype(jnp.float32)                 # SMEM scalars
    bd = params["bd"].reshape(1).astype(jnp.float32)
    w1 = params["w1"].reshape(1, -1).T.astype(jnp.float32)           # (HID, 1)
    b1 = params["b1"].reshape(1, -1).T.astype(jnp.float32)           # (HID, 1)
    w2 = params["w2"].astype(jnp.float32)                            # (HID, CD)
    b2 = params["b2"].reshape(1, -1).astype(jnp.float32)             # (1, CD)
    wcT = params["wc"].T.astype(jnp.float32)                         # (HID, CD)
    bh = params["bh"].reshape(1, -1).T.astype(jnp.float32)           # (HID, 1)
    HID, CD = w2.shape

    kernel = _make_fused_depth_encoder_kernel(C, 1.0 / HW, n_pad)
    c, hcb = pl.pallas_call(
        kernel,
        out_shape=(jax.ShapeDtypeStruct((B, 1, CD), jnp.float32),
                   jax.ShapeDtypeStruct((B, HID, 1), jnp.float32)),
        grid=(B, n_tiles),
        in_specs=[
            pl.BlockSpec((1, C, TILE), lambda b, t: (b, 0, t)),      # x
            pl.BlockSpec((1, 1, TILE), lambda b, t: (b, 0, t)),      # mask
            pl.BlockSpec(memory_space=pltpu.MemorySpace.SMEM),       # wd
            pl.BlockSpec(memory_space=pltpu.MemorySpace.SMEM),       # bd
            pl.BlockSpec((HID, 1), lambda b, t: (0, 0)),             # w1
            pl.BlockSpec((HID, 1), lambda b, t: (0, 0)),             # b1
            pl.BlockSpec((HID, CD), lambda b, t: (0, 0)),            # w2
            pl.BlockSpec((1, CD), lambda b, t: (0, 0)),              # b2
            pl.BlockSpec((HID, CD), lambda b, t: (0, 0)),            # wc^T
            pl.BlockSpec((HID, 1), lambda b, t: (0, 0)),             # bh
        ],
        out_specs=(pl.BlockSpec((1, 1, CD), lambda b, t: (b, 0, 0)),
                   pl.BlockSpec((1, HID, 1), lambda b, t: (b, 0, 0))),
        scratch_shapes=[pltpu.VMEM((HID, 1), jnp.float32)],
        compiler_params=pltpu.CompilerParams(
            dimension_semantics=("parallel", "arbitrary")),
    )(x, m, wd, bd, w1, b1, w2, b2, wcT, bh)
    return c.reshape(B, CD), hcb


# --------------------------------------------------------------------------- #
# Kernel 2: occupancy decoder (p, z, c) -> logits.                            #
#   z is the empty (B, 0) latent of the default prior -> contributes nothing. #
#   The c-dependent term is pre-folded into hc_b, so the per-tile body only   #
#   touches p, wp, wo, bo. Points-on-lanes layout, lane-dense logits row.     #
# --------------------------------------------------------------------------- #
def decoder_kernel(pT_ref, hcb_ref, wpT_ref, wo_ref, bo_ref, out_ref):
    pr = pT_ref[0]                                     # (3, TILE_T) points on lanes
    wpT = wpT_ref[...]                                 # (HID, 3)
    # hp = wp^T @ p, K=3 unrolled as VPU FMAs (too small to be worth the MXU)
    hp = (wpT[:, 0:1] * pr[0:1, :]
          + wpT[:, 1:2] * pr[1:2, :]
          + wpT[:, 2:3] * pr[2:3, :])                  # (HID, TILE_T)
    h = jnp.maximum(hp + hcb_ref[0], 0.0)              # (HID, TILE_T)
    logits = jnp.sum(h * wo_ref[...], axis=0, keepdims=True) + bo_ref[0]  # (1,TILE_T)
    out_ref[...] = logits[None]                        # lane-dense row


def decode(p, hcb, params, *, tile_t=512):
    """p (B,T,3), hc_b (B,HID,1) -> logits (B,T)."""
    B, T, _ = p.shape
    wpT = params["wp"].T.astype(jnp.float32)                         # (HID, 3)
    wo = params["wo"].reshape(1, -1).T.astype(jnp.float32)           # (HID, 1)
    bo = params["bo"].reshape(1).astype(jnp.float32)                 # SMEM scalar
    HID = wpT.shape[0]

    TILE_T, Tp = _pick_tile(T, tile_t)
    n_tiles = Tp // TILE_T
    # TODO(synk): accept p already as (B,3,T) from the producer to drop this copy.
    pT = jnp.transpose(p, (0, 2, 1)).astype(jnp.float32)             # (B, 3, T)
    if Tp != T:
        pT = jnp.pad(pT, ((0, 0), (0, 0), (0, Tp - T)))

    out = pl.pallas_call(
        decoder_kernel,
        out_shape=jax.ShapeDtypeStruct((B, 1, Tp), jnp.float32),
        grid=(B, n_tiles),
        in_specs=[
            pl.BlockSpec((1, 3, TILE_T), lambda b, t: (b, 0, t)),
            pl.BlockSpec((1, HID, 1), lambda b, t: (b, 0, 0)),       # hc_b
            pl.BlockSpec((HID, 3), lambda b, t: (0, 0)),             # wp^T
            pl.BlockSpec((HID, 1), lambda b, t: (0, 0)),             # wo
            pl.BlockSpec(memory_space=pltpu.MemorySpace.SMEM),       # bo
        ],
        out_specs=pl.BlockSpec((1, 1, TILE_T), lambda b, t: (b, 0, t)),
        compiler_params=pltpu.CompilerParams(
            dimension_semantics=("parallel", "parallel")),
    )(pT, hcb, wpT, wo, bo)
    return out.reshape(B, Tp)[:, :T]


# --------------------------------------------------------------------------- #
# Full forward pass (OccupancyWithDepthNetwork.forward_full, inference path)  #
# --------------------------------------------------------------------------- #
def occupancy_with_depth_forward(p, inputs_nchw, gt_mask_nchw, params, *,
                                 max_tile_hw=16384, tile_t=512):
    """p: (B,T,3); inputs: (B,C,H,W); gt_mask: (B,1,H,W) bool -> logits (B,T)."""
    c, hcb = depth_encode(inputs_nchw, gt_mask_nchw, params,
                          max_tile_hw=max_tile_hw)
    _ = c  # c is folded into hc_b = wc^T c + bh inside the fused encoder kernel
    # z = p0_z.sample((B,)) with the default empty Normal prior -> shape (B, 0),
    # contributes nothing to the decoder (represented implicitly).
    logits = decode(p, hcb, params, tile_t=tile_t)
    return logits
    # TODO(synk): train_loss / compute_elbo branches (BCE loss, KL of q_z) and the
    # space_carver / decoder_local paths are not exercised by the default forward.


# --------------------------------------------------------------------------- #
# Pure-JAX reference for verification                                          #
# --------------------------------------------------------------------------- #
def reference_forward(p, inputs_nchw, gt_mask_nchw, params):
    x = jnp.transpose(inputs_nchw, (0, 2, 3, 1))
    m = jnp.transpose(gt_mask_nchw, (0, 2, 3, 1)).astype(jnp.float32)
    B, H, W, C = x.shape
    depth = jnp.einsum("bhwc,c->bhw", x, params["wd"][0]) + params["bd"][0, 0]
    depth = depth[..., None] * m
    feat = jnp.maximum(depth * params["w1"][0] + params["b1"][0], 0.0)   # (B,H,W,HID)
    pooled = feat.reshape(B, H * W, -1).mean(axis=1)                     # (B,HID)
    c = pooled @ params["w2"] + params["b2"][0]                          # (B,CD)
    h = jnp.maximum(jnp.einsum("btd,dh->bth", p, params["wp"])
                    + (c @ params["wc"])[:, None, :] + params["bh"][0], 0.0)
    logits = jnp.einsum("bth,h->bt", h, params["wo"][0]) + params["bo"][0, 0]
    return logits


def _make_params(key, C, HID, CD):
    keys = jax.random.split(key, 11)
    return {
        "wd": 0.1 * jax.random.normal(keys[0], (1, C), jnp.float32),
        "bd": 0.1 * jax.random.normal(keys[1], (1, 1), jnp.float32),
        "w1": 0.1 * jax.random.normal(keys[2], (1, HID), jnp.float32),
        "b1": 0.1 * jax.random.normal(keys[3], (1, HID), jnp.float32),
        "w2": 0.1 * jax.random.normal(keys[4], (HID, CD), jnp.float32),
        "b2": 0.1 * jax.random.normal(keys[5], (1, CD), jnp.float32),
        "wp": 0.1 * jax.random.normal(keys[6], (3, HID), jnp.float32),
        "wc": 0.1 * jax.random.normal(keys[7], (CD, HID), jnp.float32),
        "bh": 0.1 * jax.random.normal(keys[8], (1, HID), jnp.float32),
        "wo": 0.1 * jax.random.normal(keys[9], (1, HID), jnp.float32),
        "bo": 0.1 * jax.random.normal(keys[10], (1, 1), jnp.float32),
    }


if __name__ == "__main__":
    key = jax.random.PRNGKey(0)
    k_in, k_mask, k_p, k_par, k_in2, k_mask2, k_p2, k_par2 = jax.random.split(key, 8)

    # ------------------------------------------------------------------ test 1
    B, C, H, W, T, HID, CD = 2, 4, 16, 16, 8, 32, 32
    inputs = jax.random.normal(k_in, (B, C, H, W), jnp.float32)
    gt_mask = jax.random.uniform(k_mask, (B, 1, H, W)) > 0.3          # bool mask
    p = jax.random.uniform(k_p, (B, T, 3), jnp.float32, -0.5, 0.5)
    params = _make_params(k_par, C, HID, CD)

    # (a) default config: single full-extent HW tile, single T tile
    fwd_default = jax.jit(occupancy_with_depth_forward)
    logits_a = jax.block_until_ready(fwd_default(p, inputs, gt_mask, params))
    # (b) max_tile_hw=128: HW=256 split into 2 tiles -> exercises the
    #     accumulate-then-finalize reduction path (no padding needed).
    fwd_tiled = jax.jit(functools.partial(occupancy_with_depth_forward,
                                          max_tile_hw=128))
    logits_b = jax.block_until_ready(fwd_tiled(p, inputs, gt_mask, params))

    ref1 = reference_forward(p, inputs, gt_mask, params)
    assert logits_a.shape == (B, T), logits_a.shape
    assert jnp.allclose(logits_a, ref1, atol=1e-4, rtol=1e-4), "test1a mismatch"
    assert jnp.allclose(logits_b, ref1, atol=1e-4, rtol=1e-4), "test1b mismatch"

    # ------------------------------------------------------------------ test 2
    # Non-multiple-of-128 HW with forced tiling -> exercises the analytic
    # padded-pixel correction; T > tile_t -> exercises decoder T tiling + slice.
    B2, C2, H2, W2, T2 = 1, 3, 18, 18, 200
    inputs2 = jax.random.normal(k_in2, (B2, C2, H2, W2), jnp.float32)
    gt_mask2 = jax.random.uniform(k_mask2, (B2, 1, H2, W2)) > 0.3
    p2 = jax.random.uniform(k_p2, (B2, T2, 3), jnp.float32, -0.5, 0.5)
    params2 = _make_params(k_par2, C2, HID, CD)

    fwd2 = jax.jit(functools.partial(occupancy_with_depth_forward,
                                     max_tile_hw=128, tile_t=128))
    logits2 = jax.block_until_ready(fwd2(p2, inputs2, gt_mask2, params2))
    ref2 = reference_forward(p2, inputs2, gt_mask2, params2)
    assert logits2.shape == (B2, T2), logits2.shape
    assert jnp.allclose(logits2, ref2, atol=1e-4, rtol=1e-4), "test2 mismatch"

    print("KERNEL_OK")
</pallas_src>

<mosaic_0001>
module attributes {stable_mosaic.version = 11 : i64} {
  func.func @kernel(%arg0: i32, %arg1: i32, %arg2: memref<1x4x256xf32, #tpu.memory_space<vmem>>, %arg3: memref<1x1x256xf32, #tpu.memory_space<vmem>>, %arg4: memref<4xf32, #tpu.memory_space<smem>>, %arg5: memref<1xf32, #tpu.memory_space<smem>>, %arg6: memref<32x1xf32, #tpu.memory_space<vmem>>, %arg7: memref<32x1xf32, #tpu.memory_space<vmem>>, %arg8: memref<32x32xf32, #tpu.memory_space<vmem>>, %arg9: memref<1x32xf32, #tpu.memory_space<vmem>>, %arg10: memref<32x32xf32, #tpu.memory_space<vmem>>, %arg11: memref<32x1xf32, #tpu.memory_space<vmem>>, %arg12: memref<1x1x32xf32, #tpu.memory_space<vmem>>, %arg13: memref<1x32x1xf32, #tpu.memory_space<vmem>>, %arg14: memref<32x1xf32, #tpu.memory_space<vmem>>) attributes {dimension_semantics = [#tpu.dimension_semantics<parallel>, #tpu.dimension_semantics<arbitrary>], iteration_bounds = array<i64: 2, 1>, scalar_prefetch = 0 : i64, scratch_operands = 1 : i64, tpu.core_type = #tpu.core_type<tc>, window_params = [{transform_indices = @transform_0, window_bounds = array<i64: 1, 4, 256>}, {transform_indices = @transform_1, window_bounds = array<i64: 1, 1, 256>}, {transform_indices = @transform_2, window_bounds = array<i64: 4>}, {transform_indices = @transform_3, window_bounds = array<i64: 1>}, {pipeline_mode = #tpu.pipeline_mode<synchronous>, transform_indices = @transform_4, window_bounds = array<i64: 32, 1>}, {pipeline_mode = #tpu.pipeline_mode<synchronous>, transform_indices = @transform_5, window_bounds = array<i64: 32, 1>}, {pipeline_mode = #tpu.pipeline_mode<synchronous>, transform_indices = @transform_6, window_bounds = array<i64: 32, 32>}, {pipeline_mode = #tpu.pipeline_mode<synchronous>, transform_indices = @transform_7, window_bounds = array<i64: 1, 32>}, {pipeline_mode = #tpu.pipeline_mode<synchronous>, transform_indices = @transform_8, window_bounds = array<i64: 32, 32>}, {pipeline_mode = #tpu.pipeline_mode<synchronous>, transform_indices = @transform_9, window_bounds = array<i64: 32, 1>}, {transform_indices = @transform_10, window_bounds = array<i64: 1, 1, 32>}, {transform_indices = @transform_11, window_bounds = array<i64: 1, 32, 1>}]} {
    %c0_i32 = arith.constant 0 : i32
    %0 = arith.cmpi eq, %arg1, %c0_i32 : i32
    %1 = arith.extui %0 : i1 to i32
    %c0_i32_0 = arith.constant 0 : i32
    %2 = arith.cmpi ne, %1, %c0_i32_0 : i32
    scf.if %2 {
      %cst_19 = arith.constant 0.000000e+00 : f32
      %47 = vector.broadcast %cst_19 : f32 to vector<32x1xf32>
      %c0_20 = arith.constant 0 : index
      %c0_21 = arith.constant 0 : index
      %48 = vector.load %arg14[%c0_20, %c0_21] : memref<32x1xf32, #tpu.memory_space<vmem>>, vector<32x1xf32>
      tpu.vector_store %arg14[%c0_20, %c0_21], %47 {strides = array<i32>} : memref<32x1xf32, #tpu.memory_space<vmem>>, vector<32x1xf32>,
    } else {
    }
    %c0 = arith.constant 0 : index
    %c0_1 = arith.constant 0 : index
    %c0_2 = arith.constant 0 : index
    %3 = vector.load %arg2[%c0, %c0_1, %c0_2] : memref<1x4x256xf32, #tpu.memory_space<vmem>>, vector<1x4x256xf32>
    %4 = vector.shape_cast %3 : vector<1x4x256xf32> to vector<4x256xf32>
    %5 = vector.extract_strided_slice %4 {offsets = [0, 0], sizes = [1, 256], strides = [1, 1]} : vector<4x256xf32> to vector<1x256xf32>
    %c0_3 = arith.constant 0 : index
    %6 = memref.load %arg4[%c0_3] : memref<4xf32, #tpu.memory_space<smem>>
    %7 = vector.broadcast %6 : f32 to vector<1x256xf32>
    %8 = arith.mulf %5, %7 : vector<1x256xf32>
    %9 = vector.extract_strided_slice %4 {offsets = [1, 0], sizes = [1, 256], strides = [1, 1]} : vector<4x256xf32> to vector<1x256xf32>
    %c1 = arith.constant 1 : index
    %10 = memref.load %arg4[%c1] : memref<4xf32, #tpu.memory_space<smem>>
    %11 = vector.broadcast %10 : f32 to vector<1x256xf32>
    %12 = arith.mulf %9, %11 : vector<1x256xf32>
    %13 = arith.addf %8, %12 : vector<1x256xf32>
    %14 = vector.extract_strided_slice %4 {offsets = [2, 0], sizes = [1, 256], strides = [1, 1]} : vector<4x256xf32> to vector<1x256xf32>
    %c2 = arith.constant 2 : index
    %15 = memref.load %arg4[%c2] : memref<4xf32, #tpu.memory_space<smem>>
    %16 = vector.broadcast %15 : f32 to vector<1x256xf32>
    %17 = arith.mulf %14, %16 : vector<1x256xf32>
    %18 = arith.addf %13, %17 : vector<1x256xf32>
    %19 = vector.extract_strided_slice %4 {offsets = [3, 0], sizes = [1, 256], strides = [1, 1]} : vector<4x256xf32> to vector<1x256xf32>
    %c3 = arith.constant 3 : index
    %20 = memref.load %arg4[%c3] : memref<4xf32, #tpu.memory_space<smem>>
    %21 = vector.broadcast %20 : f32 to vector<1x256xf32>
    %22 = arith.mulf %19, %21 : vector<1x256xf32>
    %23 = arith.addf %18, %22 : vector<1x256xf32>
    %c0_4 = arith.constant 0 : index
    %24 = memref.load %arg5[%c0_4] : memref<1xf32, #tpu.memory_space<smem>>
    %25 = vector.broadcast %24 : f32 to vector<1x256xf32>
    %26 = arith.addf %23, %25 : vector<1x256xf32>
    %c0_5 = arith.constant 0 : index
    %c0_6 = arith.constant 0 : index
    %c0_7 = arith.constant 0 : index
    %27 = vector.load %arg3[%c0_5, %c0_6, %c0_7] : memref<1x1x256xf32, #tpu.memory_space<vmem>>, vector<1x1x256xf32>
    %28 = vector.shape_cast %27 : vector<1x1x256xf32> to vector<1x256xf32>
    %29 = arith.mulf %26, %28 : vector<1x256xf32>
    %c0_8 = arith.constant 0 : index
    %c0_9 = arith.constant 0 : index
    %30 = vector.load %arg6[%c0_8, %c0_9] : memref<32x1xf32, #tpu.memory_space<vmem>>, vector<32x1xf32>
    %31 = vector.broadcast %30 : vector<32x1xf32> to vector<32x256xf32>
    %32 = vector.broadcast %29 : vector<1x256xf32> to vector<32x256xf32>
    %33 = arith.mulf %31, %32 : vector<32x256xf32>
    %c0_10 = arith.constant 0 : index
    %c0_11 = arith.constant 0 : index
    %34 = vector.load %arg7[%c0_10, %c0_11] : memref<32x1xf32, #tpu.memory_space<vmem>>, vector<32x1xf32>
    %35 = vector.broadcast %34 : vector<32x1xf32> to vector<32x256xf32>
    %36 = arith.addf %33, %35 : vector<32x256xf32>
    %cst = arith.constant 0.000000e+00 : f32
    %37 = vector.broadcast %cst : f32 to vector<32x256xf32>
    %38 = arith.maximumf %36, %37 : vector<32x256xf32>
    %c0_12 = arith.constant 0 : index
    %c0_13 = arith.constant 0 : index
    %39 = vector.load %arg14[%c0_12, %c0_13] : memref<32x1xf32, #tpu.memory_space<vmem>>, vector<32x1xf32>
    %cst_14 = arith.constant dense<0.000000e+00> : vector<32xf32>
    %40 = vector.multi_reduction <add>, %38, %cst_14 [1] : vector<32x256xf32> to vector<32xf32>
    %41 = vector.shape_cast %40 : vector<32xf32> to vector<32x1xf32>
    %42 = arith.addf %39, %41 : vector<32x1xf32>
    %c0_15 = arith.constant 0 : index
    %c0_16 = arith.constant 0 : index
    %43 = vector.load %arg14[%c0_15, %c0_16] : memref<32x1xf32, #tpu.memory_space<vmem>>, vector<32x1xf32>
    tpu.vector_store %arg14[%c0_15, %c0_16], %42 {strides = array<i32>} : memref<32x1xf32, #tpu.memory_space<vmem>>, vector<32x1xf32>,
    %c0_i32_17 = arith.constant 0 : i32
    %44 = arith.cmpi eq, %arg1, %c0_i32_17 : i32
    %45 = arith.extui %44 : i1 to i32
    %c0_i32_18 = arith.constant 0 : i32
    %46 = arith.cmpi ne, %45, %c0_i32_18 : i32
    scf.if %46 {
      %c0_19 = arith.constant 0 : index
      %c0_20 = arith.constant 0 : index
      %47 = vector.load %arg14[%c0_19, %c0_20] : memref<32x1xf32, #tpu.memory_space<vmem>>, vector<32x1xf32>
      %cst_21 = arith.constant 3.906250e-03 : f32
      %48 = vector.broadcast %cst_21 : f32 to vector<32x1xf32>
      %49 = arith.mulf %47, %48 : vector<32x1xf32>
      %c0_22 = arith.constant 0 : index
      %c0_23 = arith.constant 0 : index
      %50 = vector.load %arg8[%c0_22, %c0_23] : memref<32x32xf32, #tpu.memory_space<vmem>>, vector<32x32xf32>
      %51 = vector.broadcast %49 : vector<32x1xf32> to vector<32x32xf32>
      %52 = arith.mulf %50, %51 : vector<32x32xf32>
      %cst_24 = arith.constant dense<0.000000e+00> : vector<32xf32>
      %53 = vector.multi_reduction <add>, %52, %cst_24 [0] : vector<32x32xf32> to vector<32xf32>
      %54 = vector.shape_cast %53 : vector<32xf32> to vector<1x32xf32>
      %c0_25 = arith.constant 0 : index
      %c0_26 = arith.constant 0 : index
      %55 = vector.load %arg9[%c0_25, %c0_26] : memref<1x32xf32, #tpu.memory_space<vmem>>, vector<1x32xf32>
      %56 = arith.addf %54, %55 : vector<1x32xf32>
      %57 = vector.shape_cast %56 : vector<1x32xf32> to vector<1x1x32xf32>
      %c0_27 = arith.constant 0 : index
      %c0_28 = arith.constant 0 : index
      %c0_29 = arith.constant 0 : index
      %58 = vector.load %arg12[%c0_27, %c0_28, %c0_29] : memref<1x1x32xf32, #tpu.memory_space<vmem>>, vector<1x1x32xf32>
      tpu.vector_store %arg12[%c0_27, %c0_28, %c0_29], %57 {strides = array<i32>} : memref<1x1x32xf32, #tpu.memory_space<vmem>>, vector<1x1x32xf32>,
      %c0_30 = arith.constant 0 : index
      %c0_31 = arith.constant 0 : index
      %59 = vector.load %arg10[%c0_30, %c0_31] : memref<32x32xf32, #tpu.memory_space<vmem>>, vector<32x32xf32>
      %60 = vector.broadcast %56 : vector<1x32xf32> to vector<32x32xf32>
      %61 = arith.mulf %59, %60 : vector<32x32xf32>
      %cst_32 = arith.constant dense<0.000000e+00> : vector<32xf32>
      %62 = vector.multi_reduction <add>, %61, %cst_32 [1] : vector<32x32xf32> to vector<32xf32>
      %63 = vector.shape_cast %62 : vector<32xf32> to vector<32x1xf32>
      %c0_33 = arith.constant 0 : index
      %c0_34 = arith.constant 0 : index
      %64 = vector.load %arg11[%c0_33, %c0_34] : memref<32x1xf32, #tpu.memory_space<vmem>>, vector<32x1xf32>
      %65 = arith.addf %63, %64 : vector<32x1xf32>
      %66 = vector.shape_cast %65 : vector<32x1xf32> to vector<1x32x1xf32>
      %c0_35 = arith.constant 0 : index
      %c0_36 = arith.constant 0 : index
      %c0_37 = arith.constant 0 : index
      %67 = vector.load %arg13[%c0_35, %c0_36, %c0_37] : memref<1x32x1xf32, #tpu.memory_space<vmem>>, vector<1x32x1xf32>
      tpu.vector_store %arg13[%c0_35, %c0_36, %c0_37], %66 {strides = array<i32>} : memref<1x32x1xf32, #tpu.memory_space<vmem>>, vector<1x32x1xf32>,
    } else {
    }
    return
  }
  func.func @transform_0(%arg0: i32, %arg1: i32) -> (i32, i32, i32) {
    %c0_i32 = arith.constant 0 : i32
    %c0_i32_0 = arith.constant 0 : i32
    return %arg0, %c0_i32, %arg1 : i32, i32, i32
  }
  func.func @transform_1(%arg0: i32, %arg1: i32) -> (i32, i32, i32) {
    %c0_i32 = arith.constant 0 : i32
    %c0_i32_0 = arith.constant 0 : i32
    return %arg0, %c0_i32, %arg1 : i32, i32, i32
  }
  func.func @transform_2(%arg0: i32, %arg1: i32) -> i32 {
    %c0_i32 = arith.constant 0 : i32
    %c0_i32_0 = arith.constant 0 : i32
    return %c0_i32 : i32
  }
  func.func @transform_3(%arg0: i32, %arg1: i32) -> i32 {
    %c0_i32 = arith.constant 0 : i32
    %c0_i32_0 = arith.constant 0 : i32
    return %c0_i32 : i32
  }
  func.func @transform_4(%arg0: i32, %arg1: i32) -> (i32, i32) {
    %c0_i32 = arith.constant 0 : i32
    %c0_i32_0 = arith.constant 0 : i32
    %c0_i32_1 = arith.constant 0 : i32
    return %c0_i32, %c0_i32_0 : i32, i32
  }
  func.func @transform_5(%arg0: i32, %arg1: i32) -> (i32, i32) {
    %c0_i32 = arith.constant 0 : i32
    %c0_i32_0 = arith.constant 0 : i32
    %c0_i32_1 = arith.constant 0 : i32
    return %c0_i32, %c0_i32_0 : i32, i32
  }
  func.func @transform_6(%arg0: i32, %arg1: i32) -> (i32, i32) {
    %c0_i32 = arith.constant 0 : i32
    %c0_i32_0 = arith.constant 0 : i32
    %c0_i32_1 = arith.constant 0 : i32
    return %c0_i32, %c0_i32_0 : i32, i32
  }
  func.func @transform_7(%arg0: i32, %arg1: i32) -> (i32, i32) {
    %c0_i32 = arith.constant 0 : i32
    %c0_i32_0 = arith.constant 0 : i32
    %c0_i32_1 = arith.constant 0 : i32
    return %c0_i32, %c0_i32_0 : i32, i32
  }
  func.func @transform_8(%arg0: i32, %arg1: i32) -> (i32, i32) {
    %c0_i32 = arith.constant 0 : i32
    %c0_i32_0 = arith.constant 0 : i32
    %c0_i32_1 = arith.constant 0 : i32
    return %c0_i32, %c0_i32_0 : i32, i32
  }
  func.func @transform_9(%arg0: i32, %arg1: i32) -> (i32, i32) {
    %c0_i32 = arith.constant 0 : i32
    %c0_i32_0 = arith.constant 0 : i32
    %c0_i32_1 = arith.constant 0 : i32
    return %c0_i32, %c0_i32_0 : i32, i32
  }
  func.func @transform_10(%arg0: i32, %arg1: i32) -> (i32, i32, i32) {
    %c0_i32 = arith.constant 0 : i32
    %c0_i32_0 = arith.constant 0 : i32
    %c0_i32_1 = arith.constant 0 : i32
    return %arg0, %c0_i32, %c0_i32_0 : i32, i32, i32
  }
  func.func @transform_11(%arg0: i32, %arg1: i32) -> (i32, i32, i32) {
    %c0_i32 = arith.constant 0 : i32
    %c0_i32_0 = arith.constant 0 : i32
    %c0_i32_1 = arith.constant 0 : i32
    return %arg0, %c0_i32, %c0_i32_0 : i32, i32, i32
  }
}

module attributes {stable_mosaic.version = 11 : i64} {
  func.func @decoder_kernel(%arg0: i32, %arg1: i32, %arg2: memref<1x3x8xf32, #tpu.memory_space<vmem>>, %arg3: memref<1x32x1xf32, #tpu.memory_space<vmem>>, %arg4: memref<32x3xf32, #tpu.memory_space<vmem>>, %arg5: memref<32x1xf32, #tpu.memory_space<vmem>>, %arg6: memref<1xf32, #tpu.memory_space<smem>>, %arg7: memref<1x1x8xf32, #tpu.memory_space<vmem>>) attributes {dimension_semantics = [#tpu.dimension_semantics<parallel>, #tpu.dimension_semantics<parallel>], iteration_bounds = array<i64: 2, 1>, scalar_prefetch = 0 : i64, scratch_operands = 0 : i64, tpu.core_type = #tpu.core_type<tc>, window_params = [{transform_indices = @transform_0, window_bounds = array<i64: 1, 3, 8>}, {transform_indices = @transform_1, window_bounds = array<i64: 1, 32, 1>}, {pipeline_mode = #tpu.pipeline_mode<synchronous>, transform_indices = @transform_2, window_bounds = array<i64: 32, 3>}, {pipeline_mode = #tpu.pipeline_mode<synchronous>, transform_indices = @transform_3, window_bounds = array<i64: 32, 1>}, {transform_indices = @transform_4, window_bounds = array<i64: 1>}, {transform_indices = @transform_5, window_bounds = array<i64: 1, 1, 8>}]} {
    %c0 = arith.constant 0 : index
    %c0_0 = arith.constant 0 : index
    %c0_1 = arith.constant 0 : index
    %0 = vector.load %arg2[%c0, %c0_0, %c0_1] : memref<1x3x8xf32, #tpu.memory_space<vmem>>, vector<1x3x8xf32>
    %1 = vector.shape_cast %0 : vector<1x3x8xf32> to vector<3x8xf32>
    %c0_2 = arith.constant 0 : index
    %c0_3 = arith.constant 0 : index
    %2 = vector.load %arg4[%c0_2, %c0_3] : memref<32x3xf32, #tpu.memory_space<vmem>>, vector<32x3xf32>
    %3 = vector.extract_strided_slice %2 {offsets = [0, 0], sizes = [32, 1], strides = [1, 1]} : vector<32x3xf32> to vector<32x1xf32>
    %4 = vector.extract_strided_slice %1 {offsets = [0, 0], sizes = [1, 8], strides = [1, 1]} : vector<3x8xf32> to vector<1x8xf32>
    %5 = vector.broadcast %3 : vector<32x1xf32> to vector<32x8xf32>
    %6 = vector.broadcast %4 : vector<1x8xf32> to vector<32x8xf32>
    %7 = arith.mulf %5, %6 : vector<32x8xf32>
    %8 = vector.extract_strided_slice %2 {offsets = [0, 1], sizes = [32, 1], strides = [1, 1]} : vector<32x3xf32> to vector<32x1xf32>
    %9 = vector.extract_strided_slice %1 {offsets = [1, 0], sizes = [1, 8], strides = [1, 1]} : vector<3x8xf32> to vector<1x8xf32>
    %10 = vector.broadcast %8 : vector<32x1xf32> to vector<32x8xf32>
    %11 = vector.broadcast %9 : vector<1x8xf32> to vector<32x8xf32>
    %12 = arith.mulf %10, %11 : vector<32x8xf32>
    %13 = arith.addf %7, %12 : vector<32x8xf32>
    %14 = vector.extract_strided_slice %2 {offsets = [0, 2], sizes = [32, 1], strides = [1, 1]} : vector<32x3xf32> to vector<32x1xf32>
    %15 = vector.extract_strided_slice %1 {offsets = [2, 0], sizes = [1, 8], strides = [1, 1]} : vector<3x8xf32> to vector<1x8xf32>
    %16 = vector.broadcast %14 : vector<32x1xf32> to vector<32x8xf32>
    %17 = vector.broadcast %15 : vector<1x8xf32> to vector<32x8xf32>
    %18 = arith.mulf %16, %17 : vector<32x8xf32>
    %19 = arith.addf %13, %18 : vector<32x8xf32>
    %c0_4 = arith.constant 0 : index
    %c0_5 = arith.constant 0 : index
    %c0_6 = arith.constant 0 : index
    %20 = vector.load %arg3[%c0_4, %c0_5, %c0_6] : memref<1x32x1xf32, #tpu.memory_space<vmem>>, vector<1x32x1xf32>
    %21 = vector.shape_cast %20 : vector<1x32x1xf32> to vector<32x1xf32>
    %22 = vector.broadcast %21 : vector<32x1xf32> to vector<32x8xf32>
    %23 = arith.addf %19, %22 : vector<32x8xf32>
    %cst = arith.constant 0.000000e+00 : f32
    %24 = vector.broadcast %cst : f32 to vector<32x8xf32>
    %25 = arith.maximumf %23, %24 : vector<32x8xf32>
    %c0_7 = arith.constant 0 : index
    %c0_8 = arith.constant 0 : index
    %26 = vector.load %arg5[%c0_7, %c0_8] : memref<32x1xf32, #tpu.memory_space<vmem>>, vector<32x1xf32>
    %27 = vector.broadcast %26 : vector<32x1xf32> to vector<32x8xf32>
    %28 = arith.mulf %25, %27 : vector<32x8xf32>
    %cst_9 = arith.constant dense<0.000000e+00> : vector<8xf32>
    %29 = vector.multi_reduction <add>, %28, %cst_9 [0] : vector<32x8xf32> to vector<8xf32>
    %30 = vector.shape_cast %29 : vector<8xf32> to vector<1x8xf32>
    %c0_10 = arith.constant 0 : index
    %31 = memref.load %arg6[%c0_10] : memref<1xf32, #tpu.memory_space<smem>>
    %32 = vector.broadcast %31 : f32 to vector<1x8xf32>
    %33 = arith.addf %30, %32 : vector<1x8xf32>
    %34 = vector.shape_cast %33 : vector<1x8xf32> to vector<1x1x8xf32>
    %c0_11 = arith.constant 0 : index
    %c0_12 = arith.constant 0 : index
    %c0_13 = arith.constant 0 : index
    %35 = vector.load %arg7[%c0_11, %c0_12, %c0_13] : memref<1x1x8xf32, #tpu.memory_space<vmem>>, vector<1x1x8xf32>
    tpu.vector_store %arg7[%c0_11, %c0_12, %c0_13], %34 {strides = array<i32>} : memref<1x1x8xf32, #tpu.memory_space<vmem>>, vector<1x1x8xf32>,
    return
  }
  func.func @transform_0(%arg0: i32, %arg1: i32) -> (i32, i32, i32) {
    %c0_i32 = arith.constant 0 : i32
    %c0_i32_0 = arith.constant 0 : i32
    return %arg0, %c0_i32, %arg1 : i32, i32, i32
  }
  func.func @transform_1(%arg0: i32, %arg1: i32) -> (i32, i32, i32) {
    %c0_i32 = arith.constant 0 : i32
    %c0_i32_0 = arith.constant 0 : i32
    %c0_i32_1 = arith.constant 0 : i32
    return %arg0, %c0_i32, %c0_i32_0 : i32, i32, i32
  }
  func.func @transform_2(%arg0: i32, %arg1: i32) -> (i32, i32) {
    %c0_i32 = arith.constant 0 : i32
    %c0_i32_0 = arith.constant 0 : i32
    %c0_i32_1 = arith.constant 0 : i32
    return %c0_i32, %c0_i32_0 : i32, i32
  }
  func.func @transform_3(%arg0: i32, %arg1: i32) -> (i32, i32) {
    %c0_i32 = arith.constant 0 : i32
    %c0_i32_0 = arith.constant 0 : i32
    %c0_i32_1 = arith.constant 0 : i32
    return %c0_i32, %c0_i32_0 : i32, i32
  }
  func.func @transform_4(%arg0: i32, %arg1: i32) -> i32 {
    %c0_i32 = arith.constant 0 : i32
    %c0_i32_0 = arith.constant 0 : i32
    return %c0_i32 : i32
  }
  func.func @transform_5(%arg0: i32, %arg1: i32) -> (i32, i32, i32) {
    %c0_i32 = arith.constant 0 : i32
    %c0_i32_0 = arith.constant 0 : i32
    return %arg0, %c0_i32, %arg1 : i32, i32, i32
  }
}

</mosaic_0001>

<bundles_post_ra>
// kernel: occupancy_with_depth_forward.3
= control target key start
LH: loop header
LB: loop body
LE: loop exit
PB: predicated region body
PF: predicated region fallthrough
CT: control target
= control target key end

     0   :  { %s849_s0 = inlined_call_operand.vmem [shape: f32[2,3,8], index: 0, kind: input, shape index: {}]   ;;  %s850_s1 = inlined_call_operand.vmem [shape: f32[2,32,1], index: 1, kind: input, shape index: {}]   ;;  %s851_s2 = inlined_call_operand.vmem [shape: f32[32,3], index: 2, kind: input, shape index: {}]   ;;  %s852_s3 = inlined_call_operand.vmem [shape: f32[32,1], index: 3, kind: input, shape index: {}]   ;;  %s853_s4 = inlined_call_operand.<no memory space> [shape: f32[1], index: 4, kind: input, shape index: {}]   ;;  %s854_s5 = inlined_call_operand.hbm [shape: f32[2,1,8], index: 5, kind: output, shape index: {}]  }
   0x1   :  { %10 = sst [smem:[#allocation2]] %s853_s4 }
   0x2   :  { %11 = vsyncpa [#allocation4], 0 }
   0x3   :  { %13 = vsyncpa [#allocation4 + $0x1], 0  ;;  %s719_s20 = smov 0   ;;  %s721_s21 = smov 0  }
   0x4   :  { %s723_s22 = smov 0   ;;  %s725_s23 = smov 0  }
   0x5   :  { %s727_s24 = smov 0   ;;  %s729_s25 = smov 0  }
   0x6 LB: > { %s526_s4 = sadd.s32 4294967295, %s680_s25   ;;  %s527_s26 = sadd.s32 4294967294, %s680_s25   ;;  %s680_s25 = sphi %s729_s25, %s19_s25   ;;  %s676_s24 = sphi %s727_s24, %s861_s24   ;;  %s672_s23 = sphi %s725_s23, %s860_s23   ;;  %s668_s22 = sphi %s723_s22, %s859_s22   ;;  %s664_s21 = sphi %s721_s21, %s858_s21   ;;  %s660_s20 = sphi %s719_s20, %s857_s20  }
   0x7   : > { %s31_s27 = sadd.s32 1, %s676_s24  ;;  %s157_s28 = sadd.s32 1, %s668_s22 }
   0x8   : > { %p33_p0 = scmp.ge.s32.totalorder %s31_s27, 2  ;;  %p167_p1 = scmp.ne.s32.totalorder %s668_s22, %s664_s21 }
   0x9   : > { %p168_p2 = scmp.eq.s32.totalorder %s526_s4, 1  ;;  %p173_p3 = scmp.ne.s32.totalorder %s664_s21, %s660_s20 }
   0xa   : > { %s863_s27 = smov (%p33_p0, %s31_s27), 0  ;;  %p174_p5 = scmp.eq.s32.totalorder %s527_s26, 1 }
   0xb   : > { %p759_p4 = por %p168_p2, %p167_p1  ;;  %s152_s30 = ssub.s32 %s676_s24, %s863_s27 }
   0xc   : > { %p530_p6 = scmp.ge.s32.totalorder %s680_s25, 1  ;;  %p155_p7 = scmp.eq.s32.totalorder %s152_s30, 0 }
   0xd   : > { %p766_p8 = por %p174_p5, %p173_p3  ;;  %p219_p9 = scmp.lt.s32.totalorder %s680_s25, 3 }
   0xe   : > { %s772_s7 = scalar_select %p155_p7, %s668_s22, %s157_s28  }
   0xf   : > { %p220_p10 = pnand %p530_p6, %p219_p9 }
  0x10   : > { %p253_p11 = scmp.lt.s32.totalorder (!%p220_p10), %s672_s23, 1  ;;  %s251_s18 = sand.u32 (!%p220_p10), 1, %s664_s21  }
  0x11   : > { %223 = sbr.rel (%p220_p10) target bundleno = 226 (0xe2), region = 40  ;;  %s534_s19 = sshll.u32 (!%p220_p10), %s672_s23, 4 }
  0x12   : > { %s445_s8 = scalar_lea.hbm (!%p220_p10), %s854_s5, %s534_s19  ;;  %s434_s9 = scalar_lea.sflag (!%p220_p10), [#allocation4], %s251_s18 }
  0x13   : > { %s685_s11 = smov (!%p220_p10), [#allocation3]  }
  0x14   : > { %s608_s12 = sshll.u32 (!%p220_p10), %s685_s11, 4  ;;  %s609_s12 = int_to_ptr.vmem [resolvable:$false] %s608_s12 }
  0x16   : > { %v266_v0 = vld [vmem:[%s851_s2] sm:$0xff]  ;;  %v682_v1 = vmov 2   ;;  %v683_v2 = vmov 1   ;;  %v267_v3 = vld [vmem:[%s851_s2 + $0x8] sm:$0xff]  ;;  %v269_v4 = vld [vmem:[%s851_s2 + $0x18] sm:$0xff]  ;;  %v684_v6 = vmov 0   ;;  %v290_v21 = vlaneseq }
  0x17   : > { %597 = vset.pattern.permute.xlu0 %v682_v1  ;;  %596 = vset.pattern.permute.xlu1 %v683_v2  ;;  %v268_v5 = vld [vmem:[%s851_s2 + $0x10] sm:$0xff]  ;;  %s788_s16 = scalar_select %p253_p11, %s672_s23, 1  ;;  %v387_v9 = vld [vmem:[%s852_s3 + $0x8] sm:$0xff]  ;;  %v389_v11 = vld [vmem:[%s852_s3 + $0x18] sm:$0xff]  ;;  %vm414_vm0 = vcmask 64512   ;;  %vm431_vm1 = vcmask 57344  }
  0x18   : > { %327 = vperm.xlu0 %597, %v266_v0   ;;  %299 = vperm.xlu1 %596, %v266_v0   ;;  %v386_v13 = vld [vmem:[%s852_s3] sm:$0xff]  ;;  %v388_v14 = vld [vmem:[%s852_s3 + $0x10] sm:$0xff]  ;;  %v291_v24 = vshrl.u32 %v290_v21, 7  ;;  %s610_s23 = scalar_lea.vmem %s609_s12, 32 }
  0x19   : > { %s537_s17 = sshll.u32 %s788_s16, 5  ;;  %s531_s13 = sshll.u32 %s788_s16, 2 }
  0x1a   : > { %s264_s4 = scalar_lea.vmem %s850_s1, %s537_s17  ;;  %s259_s17 = scalar_lea.vmem %s849_s0, %s531_s13  ;;  %v292_v25 = vsub.s32 0, %v291_v24  ;;  %v316_v28 = vsub.s32 1, %v291_v24  ;;  %v344_v30 = vsub.s32 2, %v291_v24 }
  0x1b   : > { %v354_v7 = vld [vmem:[%s264_s4] sm:$0xff]  ;;  %v357_v8 = vld [vmem:[%s264_s4 + $0x18] sm:$0xff]  ;;  %v355_v10 = vld [vmem:[%s264_s4 + $0x8] sm:$0xff]  ;;  %s428_s16 = sld [smem:[#allocation2]] }
  0x1c   : > { %600 = vset.pattern.permute.xlu0 %v683_v2  ;;  %303 = vperm.xlu1 %596, %v267_v3   ;;  %v356_v12 = vld [vmem:[%s264_s4 + $0x10] sm:$0xff]  ;;  %v265_v29 = vld [vmem:[%s259_s17] sm:$0x7]  ;;  %s252_s4 = scalar_lea.vmem [#allocation3], %s251_s18 }
  0x1d   : > { %311 = vperm.xlu0 %600, %v269_v4   ;;  %v293_v31 = vrot.slane %v265_v29, %v292_v25  ;;  %v317_v32 = vrot.slane %v265_v29, %v316_v28  ;;  %v345_v36 = vrot.slane %v265_v29, %v344_v30  ;;  %s447_s26 = sshll.u32 %s252_s4, 4  ;;  %s448_s26 = int_to_ptr.vmem [resolvable:$true] %s447_s26 }
  0x1e   : > { %s604_s10 = scalar_lea.vmem %s448_s26, 16  ;;  %p611_p1 = scmp.lt.s32.totalorder %s448_s26, %s609_s12 }
  0x1f   : > { %p605_p12 = scmp.ne.s32.totalorder %s448_s26, %s604_s10  ;;  %p612_p2 = scmp.lt.s32.totalorder %s610_s23, %s604_s10 }
  0x20   : > { %307 = vperm.xlu1 %596, %v268_v5  }
  0x21   : > { %601 = vset.pattern.permute.xlu0 %v684_v6  ;;  %v429_v24 = vstv %s428_s16  ;;  %p606_p13 = pnand %p605_p12, %p759_p4  ;;  %p613_p3 = por %p612_p2, %p611_p1 }
  0x22   : > { %272 = vperm.xlu0 %601, %v266_v0  }
  0x23   : > { %p607_p0 = pneg %p606_p13 }
  0x24   : > { %598 = vset.pattern.permute.xlu1 %v682_v1 }
  0x25   : > { %331 = vperm.xlu1 %598, %v267_v3   ;;  %p614_p5 = pnand %p613_p3, %p607_p0 }
  0x26   : > { %277 = vperm.xlu0 %601, %v267_v3  }
  0x29   : > { %599 = vset.pattern.permute.xlu1 %v684_v6 }
  0x2a   : > { %282 = vperm.xlu0 %601, %v268_v5   ;;  %287 = vperm.xlu1 %599, %v269_v4  }
  0x2e   : > { %602 = vset.pattern.permute.xlu1 %v682_v1  ;;  %360 = vperm.xlu0 %601, %v354_v7  }
  0x2f   : > { %335 = vperm.xlu1 %602, %v268_v5  }
  0x32   : > { %375 = vperm.xlu0 %601, %v357_v8  }
  0x33   : > { %339 = vperm.xlu1 %602, %v269_v4  }
  0x36   : > { %397 = vperm.xlu0 %601, %v387_v9  }
  0x37   : > { %603 = vset.pattern.permute.xlu1 %v684_v6 }
  0x38   : > { %365 = vperm.xlu1 %603, %v355_v10  }
  0x3a   : > { %407 = vperm.xlu0 %601, %v389_v11  }
  0x3c   : > { %370 = vperm.xlu1 %603, %v356_v12  }
  0x40   : > { %392 = vperm.xlu1 %603, %v386_v13  }
  0x44   : > { %402 = vperm.xlu1 %603, %v388_v14  }
  0x93   : > { %v300_v15 = vpop.permute.xlu1 %299  ;;  %v328_v16 = vpop.permute.xlu0 %327 }
  0x94   : > { %v318_v39 = vmul.f32 %v317_v32, %v300_v15  ;;  %v346_v44 = vmul.f32 %v345_v36, %v328_v16 }
  0x97   : > { %v304_v17 = vpop.permute.xlu1 %303 }
  0x98   : > { %v312_v18 = vpop.permute.xlu0 %311  ;;  %v319_v37 = vmul.f32 %v317_v32, %v304_v17 }
  0x99   : > { %v321_v40 = vmul.f32 %v317_v32, %v312_v18 }
  0x9b   : > { %v308_v19 = vpop.permute.xlu1 %307 }
  0x9c   : > { %v320_v52 = vmul.f32 %v317_v32, %v308_v19 }
  0x9d   : > { %v273_v20 = vpop.permute.xlu0 %272 }
  0x9e   : > { %v294_v38 = vmul.f32 %v293_v31, %v273_v20 }
  0xa0   : > { %v332_v22 = vpop.permute.xlu1 %331  ;;  %v322_v45 = vadd.f32 %v318_v39, %v294_v38 }
  0xa1   : > { %v278_v23 = vpop.permute.xlu0 %277  ;;  %v347_v46 = vmul.f32 %v345_v36, %v332_v22 }
  0xa2   : > { %v295_v33 = vmul.f32 %v293_v31, %v278_v23  ;;  %v350_v54 = vadd.f32 %v346_v44, %v322_v45 }
  0xa4   : > { %v323_v41 = vadd.f32 %v319_v37, %v295_v33 }
  0xa5   : > { %v283_v26 = vpop.permute.xlu0 %282  ;;  %v288_v27 = vpop.permute.xlu1 %287 }
  0xa6   : > { %v297_v42 = vmul.f32 %v293_v31, %v288_v27  ;;  %v296_v49 = vmul.f32 %v293_v31, %v283_v26  ;;  %v351_v51 = vadd.f32 %v347_v46, %v323_v41 }
  0xa8   : > { %v325_v50 = vadd.f32 %v321_v40, %v297_v42  ;;  %v324_v58 = vadd.f32 %v320_v52, %v296_v49 }
  0xa9   : > { %v361_v35 = vpop.permute.xlu0 %360 }
  0xaa   : > { %v336_v34 = vpop.permute.xlu1 %335  ;;  %v378_v59 = vadd.f32 %v361_v35, %v350_v54 }
  0xab   : > { %v348_v55 = vmul.f32 %v345_v36, %v336_v34 }
  0xac   : > { %v382_v1 = vmax.f32 %v378_v59, 0.0 }
  0xad   : > { %v376_v48 = vpop.permute.xlu0 %375  ;;  %v352_v0 = vadd.f32 %v348_v55, %v324_v58 }
  0xae   : > { %v340_v43 = vpop.permute.xlu1 %339 }
  0xaf   : > { %v349_v47 = vmul.f32 %v345_v36, %v340_v43 }
  0xb1   : > { %v353_v56 = vadd.f32 %v349_v47, %v325_v50  ;;  %v398_v60 = vpop.permute.xlu0 %397 }
  0xb3   : > { %v366_v53 = vpop.permute.xlu1 %365  ;;  %v381_v63 = vadd.f32 %v376_v48, %v353_v56 }
  0xb4   : > { %v379_v57 = vadd.f32 %v366_v53, %v351_v51 }
  0xb5   : > { %v385_v5 = vmax.f32 %v381_v63, 0.0  ;;  %v408_v7 = vpop.permute.xlu0 %407 }
  0xb6   : > { %v383_v62 = vmax.f32 %v379_v57, 0.0 }
  0xb7   : > { %v371_v61 = vpop.permute.xlu1 %370  ;;  %v413_v11 = vmul.f32 %v408_v7, %v385_v5 }
  0xb8   : > { %v380_v2 = vadd.f32 %v371_v61, %v352_v0  ;;  %v411_v4 = vmul.f32 %v398_v60, %v383_v62 }
  0xb9   : > { %v420_v17 = vsel %vm414_vm0, %v413_v11, 0.0 }
  0xba   : > { %v384_v8 = vmax.f32 %v380_v2, 0.0  ;;  %v416_v12 = vsel %vm414_vm0, %v411_v4, 0.0 }
  0xbb   : > { %v393_v3 = vpop.permute.xlu1 %392 }
  0xbc   : > { %v410_v6 = vmul.f32 %v393_v3, %v382_v1 }
  0xbe   : > { %v415_v9 = vsel %vm414_vm0, %v410_v6, 0.0 }
  0xbf   : > { %v403_v10 = vpop.permute.xlu1 %402  ;;  %v417_v14 = vadd.f32 %v416_v12, %v415_v9 }
  0xc0   : > { %v412_v13 = vmul.f32 %v403_v10, %v384_v8 }
  0xc2   : > { %v418_v15 = vsel %vm414_vm0, %v412_v13, 0.0 }
  0xc3   : > { %v419_v16 = vadd.f32 %v418_v15, %v417_v14 }
  0xc5   : > { %v421_v18 = vadd.f32 %v420_v17, %v419_v16 }
  0xc7   : > { %v422_v19 = vrot.slane %v421_v18, 4 }
  0xc9   : > { %v423_v20 = vadd.f32 %v422_v19, %v421_v18 }
  0xcb   : > { %v424_v21 = vrot.slane %v423_v20, 2 }
  0xcd   : > { %v425_v22 = vadd.f32 %v424_v21, %v423_v20 }
  0xcf   : > { %v426_v23 = vrot.slane %v425_v22, 1 }
  0xd1   : > { %v427_v25 = vadd.f32 %v426_v23, %v425_v22 }
  0xd3   : > { %v430_v26 = vadd.f32 %v429_v24, %v427_v25 }
  0xd5   : > { %432 = vst.msk [vmem:[%s252_s4] sm:$0x1] %vm431_vm1, %v430_v26 }
  0xd6   : > { %617 = shalt.err (!%p614_p5)
}
  0xd7   : > { %s618_s13 = scalar_lea.hbm %s445_s8, 16  ;;  %s622_s17 = scalar_lea.hbm %s854_s5, 32 }
  0xd8   : > { %p619_p6 = scmp.ne.s32.totalorder %s445_s8, %s618_s13  ;;  %p623_p10 = scmp.lt.s32.totalorder %s445_s8, %s854_s5 }
  0xd9   : > { %p624_p11 = scmp.lt.s32.totalorder %s622_s17, %s618_s13 }
  0xda   : > { %p620_p7 = pnand %p619_p6, %p759_p4 }
  0xdb   : > { %p625_p12 = por %p624_p11, %p623_p10 }
  0xdc   : > { %p621_p9 = pneg %p620_p7 }
  0xde   : > { %p626_p13 = pnand %p625_p12, %p621_p9 }
  0xe0   : > { %629 = shalt.err (!%p626_p13)
}
  0xe1   : > { %538 = dma.vmem_to_hbm [thread:$0]  (%p759_p4), %s448_s26, 16, %s445_s8, %s434_s9  }
  0xe2 PF: > { %p544_p0 = scmp.ge.s32.totalorder %s680_s25, 2  ;;  %s459_s19 = sand.u32 1, %s660_s20  }
  0xe3   : > { %s460_s4 = scalar_lea.sflag [#allocation4], %s459_s19 }
  0xe4   : > { %p541_p1 = pnand %p544_p0, %p766_p8 }
  0xe6   : > { %p542_p2 = pneg %p541_p1 }
  0xe8   : > { %655 = dma.done.wait (%p542_p2), %s460_s4, 16  }
  0xe9   : > { %657 = vsyncadd (%p542_p2), %s460_s4, 4294967280  ;;  %s19_s25 = sadd.s32 1, %s680_s25   ;;  %s857_s20 = smov %s664_s21 }
  0xea   : > { %p16_p3 = scmp.ge.s32.totalorder %s19_s25, 4   ;;  %s858_s21 = smov %s668_s22 }
  0xeb   : > { %s859_s22 = smov %s772_s7  ;;  %s860_s23 = smov %s676_s24 }
  0xec   : > { %s861_s24 = smov %s863_s27  ;;  %18 = sbr.rel (!%p16_p3) target bundleno = 6 (0x6), region = 78 }
  0xf1   :  { %464 = vsyncpa [#allocation4], 1 }
  0xf2   :  { %466 = vsyncpa [#allocation4 + $0x1], 1 }

// kernel: occupancy_with_depth_forward.2
= control target key start
LH: loop header
LB: loop body
LE: loop exit
PB: predicated region body
PF: predicated region fallthrough
CT: control target
= control target key end

     0   :  { %s1354_s0 = inlined_call_operand.vmem [shape: f32[2,4,256], index: 0, kind: input, shape index: {}]   ;;  %s1355_s1 = inlined_call_operand.vmem [shape: f32[2,1,256], index: 1, kind: input, shape index: {}]   ;;  %s1356_s2 = inlined_call_operand.vmem [shape: f32[4], index: 2, kind: input, shape index: {}]   ;;  %s1357_s3 = inlined_call_operand.<no memory space> [shape: f32[1], index: 3, kind: input, shape index: {}]   ;;  %s1358_s4 = inlined_call_operand.vmem [shape: f32[32,1], index: 4, kind: input, shape index: {}]   ;;  %s1359_s5 = inlined_call_operand.vmem [shape: f32[32,1], index: 5, kind: input, shape index: {}]   ;;  %s1360_s6 = inlined_call_operand.vmem [shape: f32[32,32], index: 6, kind: input, shape index: {}]   ;;  %s1361_s7 = inlined_call_operand.vmem [shape: f32[1,32], index: 7, kind: input, shape index: {}]   ;;  %s1362_s8 = inlined_call_operand.vmem [shape: f32[32,32], index: 8, kind: input, shape index: {}]   ;;  %s1363_s9 = inlined_call_operand.vmem [shape: f32[32,1], index: 9, kind: input, shape index: {}]   ;;  %s1364_s10 = inlined_call_operand.hbm [shape: f32[2,1,32], index: 10, kind: output, shape index: {0}]   ;;  %s1365_s11 = inlined_call_operand.vmem [shape: f32[2,32,1], index: 11, kind: output, shape index: {1}]  }
   0x1   :  { %1366 = sst [smem:[#allocation10_spill]] %s1354_s0 }
   0x2   :  { %1367 = sst [smem:[#allocation11_spill]] %s1355_s1 }
   0x3   :  { %1368 = sst [smem:[#allocation12_spill]] %s1356_s2 }
   0x4   :  { %17 = sst [smem:[#allocation3]] %s1357_s3 }
   0x5   :  { %18 = vsyncpa [#allocation6], 0 }
   0x6   :  { %19 = vsyncpa [#allocation5], 0 }
   0x7   :  { %21 = vsyncpa [#allocation5 + $0x1], 0  ;;  %s1134_s19 = smov 0   ;;  %s1136_s20 = smov 0  }
   0x8   :  { %s1138_s21 = smov 0   ;;  %s1140_s22 = smov 0  }
   0x9   :  { %s1142_s23 = smov 0   ;;  %s1144_s24 = smov 0  }
   0xa LB: > { %s875_s3 = sadd.s32 4294967295, %s1064_s24   ;;  %s876_s25 = sadd.s32 4294967294, %s1064_s24   ;;  %s1064_s24 = sphi %s1144_s24, %s27_s24   ;;  %s1060_s23 = sphi %s1142_s23, %s1380_s23   ;;  %s1056_s22 = sphi %s1140_s22, %s1379_s22   ;;  %s1052_s21 = sphi %s1138_s21, %s1378_s21   ;;  %s1048_s20 = sphi %s1136_s20, %s1377_s20   ;;  %s1044_s19 = sphi %s1134_s19, %s1376_s19  }
   0xb   : > { %s39_s26 = sadd.s32 1, %s1060_s23  ;;  %s270_s27 = sadd.s32 1, %s1052_s21 }
   0xc   : > { %p41_p0 = scmp.ge.s32.totalorder %s39_s26, 2  ;;  %p280_p1 = scmp.ne.s32.totalorder %s1052_s21, %s1048_s20 }
   0xd   : > { %p281_p2 = scmp.eq.s32.totalorder %s875_s3, 1  ;;  %p286_p3 = scmp.ne.s32.totalorder %s1048_s20, %s1044_s19 }
   0xe   : > { %s1382_s26 = smov (%p41_p0, %s39_s26), 0  ;;  %p287_p5 = scmp.eq.s32.totalorder %s876_s25, 1 }
   0xf   : > { %p1174_p4 = por %p281_p2, %p280_p1  ;;  %s267_s29 = ssub.s32 %s1060_s23, %s1382_s26 }
  0x10   : > { %p877_p6 = scmp.ge.s32.totalorder %s1064_s24, 1  ;;  %p268_p7 = scmp.eq.s32.totalorder %s267_s29, 0 }
  0x11   : > { %p1181_p8 = por %p287_p5, %p286_p3  ;;  %p320_p9 = scmp.lt.s32.totalorder %s1064_s24, 3 }
  0x12   : > { %s1187_s12 = scalar_select %p268_p7, %s1052_s21, %s270_s27  }
  0x13   : > { %p1189_p10 = pnand %p877_p6, %p320_p9  ;;  %p1193_p11 = scmp.eq.s32.totalorder %s875_s3, 0 }
  0x14   : > { %s1373_s2 = sld [smem:[#allocation12_spill]] }
  0x15   : > { %p904_p12 = pneg %p1189_p10 }
  0x17   : > { %p905_p13 = pnand %p1193_p11, %p904_p12 }
  0x19   : > { %p971_p1 = pneg %p905_p13 }
  0x1a   : > { %s333_s17 = sshll.u32 %s1373_s2, 4  ;;  %s334_s17 = int_to_ptr.vmem [resolvable:$true] %s333_s17 }
  0x1b   : > { %s969_s18 = scalar_lea.vmem %s334_s17, 16  ;;  %p977_p5 = scmp.lt.s32.totalorder %s334_s17, %s334_s17 }
  0x1c   : > { %p970_p0 = scmp.ne.s32.totalorder %s334_s17, %s969_s18  ;;  %p978_p6 = scmp.lt.s32.totalorder %s969_s18, %s969_s18 }
  0x1e   : > { %p972_p2 = pnand %p971_p1, %p970_p0  ;;  %p979_p7 = por %p978_p6, %p977_p5 }
  0x20   : > { %p973_p3 = pneg %p972_p2 }
  0x22   : > { %p980_p9 = pnand %p979_p7, %p973_p3 }
  0x24   : > { %983 = shalt.err (!%p980_p9)
}
  0x25   : > { %s1066_s3 = smov [#allocation4]   ;;  %392 = sbr.rel (%p1189_p10) target bundleno = 640 (0x280), region = 60 }
  0x26   : > { %907 = dma.vmem_to_smem (!%p905_p13), %s334_s17, 16, %s1066_s3, [#allocation6]  }
  0x2a   : > { %1035 = dma.done.wait (%p1193_p11), [#allocation6], 16  }
  0x2b   : > { %1037 = vsyncadd (%p1193_p11), [#allocation6], 4294967280 }
  0x2c   : > { %398 = sfence }
  0x2d   : > { %v526_v0 = vld [vmem:[%s1358_s4 + $0x10] sm:$0xff]  ;;  %v524_v1 = vld [vmem:[%s1358_s4] sm:$0xff]  ;;  %v1067_v2 = vmov 0   ;;  %v525_v4 = vld [vmem:[%s1358_s4 + $0x8] sm:$0xff]  ;;  %vm477_vm0 = vcmask 7168   ;;  %v1068_v9 = vmov 0.0   ;;  %v518_v19 = vlaneseq }
  0x2e   : > { %968 = vset.pattern.permute.xlu1 %v1067_v2  ;;  %967 = vset.pattern.permute.xlu0 %v1067_v2  ;;  %v575_v3 = vld [vmem:[%s1359_s5] sm:$0xff]  ;;  %v527_v5 = vld [vmem:[%s1358_s4 + $0x18] sm:$0xff]  ;;  %v576_v6 = vld [vmem:[%s1359_s5 + $0x8] sm:$0xff]  ;;  %478 = vst.msk [vmem:[#allocation2] sm:$0xff] %vm477_vm0, %v1068_v9  ;;  %p450_p10 = scmp.lt.s32.totalorder %s1056_s22, 1  ;;  %s887_s17 = sld [smem:[#allocation4 + $0x1]] }
  0x2f   : > { %540 = vperm.xlu1 %968, %v526_v0   ;;  %530 = vperm.xlu0 %967, %v524_v1   ;;  %v578_v7 = vld [vmem:[%s1359_s5 + $0x18] sm:$0xff]  ;;  %v577_v8 = vld [vmem:[%s1359_s5 + $0x10] sm:$0xff]  ;;  %479 = vst.msk [vmem:[#allocation2 + $0x8] sm:$0xff] %vm477_vm0, %v1068_v9  ;;  %480 = vst.msk [vmem:[#allocation2 + $0x10] sm:$0xff] %vm477_vm0, %v1068_v9  ;;  %s483_s3 = sld [smem:[#allocation4]]  ;;  %v1069_v23 = vmov 286326784  }
  0x30   : > { %481 = vst.msk [vmem:[#allocation2 + $0x18] sm:$0xff] %vm477_vm0, %v1068_v9  ;;  %s1240_s14 = scalar_select %p450_p10, %s1056_s22, 1  ;;  %v516_v24 = vunpack.c.l.s4 %v1069_v23  ;;  %v519_v28 = vshrl.u32 %v518_v19, 7  ;;  %vm679_vm1 = vcmask 261120   ;;  %vm695_vm2 = vcmask 253952  }
  0x31   : > { %s889_s25 = sld [smem:[#allocation4 + $0x2]] }
  0x32   : > { %s896_s18 = sshll.u32 %s1240_s14, 3  ;;  %s1374_s0 = sld [smem:[#allocation10_spill]]  ;;  %v517_v27 = vunpack.c.0.s8 %v516_v24  ;;  %v1250_v36 = vsub.s32 0, %v519_v28  ;;  %v555_v37 = vsub.s32 4, %v519_v28 }
  0x33   : > { %581 = vperm.xlu1 %968, %v575_v3   ;;  %535 = vperm.xlu0 %967, %v525_v4   ;;  %s891_s13 = sld [smem:[#allocation4 + $0x3]]  ;;  %s884_s27 = sshll.u32 %s1240_s14, 1 }
  0x34   : > { %v487_v11 = vstv %s887_s17  ;;  %s510_s16 = sld [smem:[#allocation3]]  ;;  %v520_v30 = vsub.s32 %v517_v27, %v519_v28 }
  0x35   : > { %v484_v13 = vstv %s483_s3  ;;  %s1375_s1 = sld [smem:[#allocation11_spill]] }
  0x37   : > { %545 = vperm.xlu1 %968, %v527_v5   ;;  %586 = vperm.xlu0 %967, %v576_v6   ;;  %v495_v14 = vstv %s889_s25  ;;  %v618_v23 = vld [vmem:[#allocation2 + $0x18] sm:$0xff]  ;;  %s1070_s25 = smov [#allocation7]  }
  0x38   : > { %s457_s15 = scalar_lea.vmem %s1374_s0, %s896_s18  ;;  %s893_s0 = sshll.u32 %s1056_s22, 4 }
  0x39   : > { %v482_v10 = vld [vmem:[%s457_s15] sm:$0xff]  ;;  %v503_v18 = vstv %s891_s13  ;;  %s988_s29 = sshll.u32 %s1070_s25, 4  ;;  %s989_s29 = int_to_ptr.vmem [resolvable:$false] %s988_s29 }
  0x3a   : > { %v488_v12 = vmul.f32 %v487_v11, %v482_v10  ;;  %v485_v15 = vmul.f32 %v484_v13, %v482_v10  ;;  %v496_v17 = vmul.f32 %v495_v14, %v482_v10  ;;  %v504_v22 = vmul.f32 %v503_v18, %v482_v10  ;;  %v615_v14 = vld [vmem:[#allocation2] sm:$0xff]  ;;  %s990_s2 = scalar_lea.vmem %s989_s29, 32 }
  0x3b   : > { %596 = vperm.xlu1 %968, %v578_v7   ;;  %591 = vperm.xlu0 %967, %v577_v8   ;;  %s466_s3 = scalar_lea.vmem %s1375_s1, %s884_s27  ;;  %v511_v31 = vstv %s510_s16  ;;  %s749_s27 = scalar_lea.hbm %s1364_s10, %s893_s0 }
  0x3c   : > { %v888_v16 = vrot.slane %v488_v12, 9  ;;  %v890_v21 = vrot.slane %v496_v17, 10  ;;  %v892_v26 = vrot.slane %v504_v22, 11  ;;  %v513_v32 = vld [vmem:[%s466_s3] sm:$0x3]  ;;  %v616_v17 = vld [vmem:[#allocation2 + $0x8] sm:$0xff] }
  0x3d   : > { %v521_v34 = vrot.slane %v513_v32, %v520_v30  ;;  %s440_s3 = sand.u32 1, %s1048_s20  }
  0x3e   : > { %v493_v20 = vadd.f32 %v888_v16, %v485_v15  ;;  %s441_s17 = scalar_lea.vmem [#allocation7], %s440_s3  ;;  %s734_s18 = scalar_lea.sflag [#allocation5], %s440_s3 }
  0x3f   : > { %s751_s15 = sshll.u32 %s441_s17, 4  ;;  %s752_s15 = int_to_ptr.vmem [resolvable:$true] %s751_s15 }
  0x40   : > { %v501_v25 = vadd.f32 %v890_v21, %v493_v20  ;;  %v617_v20 = vld [vmem:[#allocation2 + $0x10] sm:$0xff]  ;;  %s984_s1 = scalar_lea.vmem %s752_s15, 16  ;;  %p991_p0 = scmp.lt.s32.totalorder %s752_s15, %s989_s29 }
  0x41   : > { %p985_p11 = scmp.ne.s32.totalorder %s752_s15, %s984_s1  ;;  %p992_p1 = scmp.lt.s32.totalorder %s990_s2, %s984_s1 }
  0x42   : > { %v509_v29 = vadd.f32 %v892_v26, %v501_v25 }
  0x43   : > { %p986_p12 = pnand %p985_p11, %p1174_p4  ;;  %p993_p2 = por %p992_p1, %p991_p0 }
  0x44   : > { %v512_v33 = vadd.f32 %v511_v31, %v509_v29 }
  0x45   : > { %p987_p13 = pneg %p986_p12 }
  0x46   : > { %v523_v35 = vmul.f32 %v521_v34, %v512_v33  ;;  %v652_v34 = vld [vmem:[%s1360_s6 + $0x8] sm:$0xff] }
  0x47   : > { %p994_p3 = pnand %p993_p2, %p987_p13 }
  0x48   : > { %v552_v38 = vrot.slane %v523_v35, %v1250_v36  ;;  %v556_v39 = vrot.slane %v523_v35, %v555_v37  ;;  %v651_v35 = vld [vmem:[%s1360_s6] sm:$0xff] }
  0x4a   : > { %v562_v40 = vrot.slane %v552_v38, %v1250_v36  ;;  %v566_v41 = vrot.slane %v556_v39, %v1250_v36 }
  0xaa   : > { %v541_v42 = vpop.permute.xlu1 %540  ;;  %v531_v43 = vpop.permute.xlu0 %530 }
  0xab   : > { %v567_v44 = vmul.f32 %v562_v40, %v531_v43  ;;  %v568_v45 = vmul.f32 %v566_v41, %v531_v43  ;;  %v571_v58 = vmul.f32 %v562_v40, %v541_v42  ;;  %v572_v59 = vmul.f32 %v566_v41, %v541_v42 }
  0xae   : > { %v582_v46 = vpop.permute.xlu1 %581  ;;  %v536_v47 = vpop.permute.xlu0 %535 }
  0xaf   : > { %v599_v48 = vadd.f32 %v582_v46, %v567_v44  ;;  %v600_v49 = vadd.f32 %v582_v46, %v568_v45  ;;  %v569_v52 = vmul.f32 %v562_v40, %v536_v47  ;;  %v570_v53 = vmul.f32 %v566_v41, %v536_v47  ;;  %v654_v45 = vld [vmem:[%s1360_s6 + $0x18] sm:$0xff] }
  0xb1   : > { %v607_v50 = vmax.f32 %v599_v48, 0.0  ;;  %v608_v51 = vmax.f32 %v600_v49, 0.0 }
  0xb2   : > { %v546_v54 = vpop.permute.xlu1 %545  ;;  %v587_v55 = vpop.permute.xlu0 %586 }
  0xb3   : > { %v601_v56 = vadd.f32 %v587_v55, %v569_v52  ;;  %v602_v57 = vadd.f32 %v587_v55, %v570_v53  ;;  %v619_v60 = vadd.f32 %v608_v51, %v607_v50  ;;  %v573_v61 = vmul.f32 %v562_v40, %v546_v54  ;;  %v653_v40 = vld [vmem:[%s1360_s6 + $0x10] sm:$0xff] }
  0xb4   : > { %v574_v62 = vmul.f32 %v566_v41, %v546_v54 }
  0xb5   : > { %v609_v63 = vmax.f32 %v601_v56, 0.0  ;;  %v610_v0 = vmax.f32 %v602_v57, 0.0  ;;  %620 = vadd.xlane.f32.xlu0 %v619_v60 }
  0xb6   : > { %v597_v1 = vpop.permute.xlu1 %596  ;;  %v592_v2 = vpop.permute.xlu0 %591 }
  0xb7   : > { %v605_v3 = vadd.f32 %v597_v1, %v573_v61  ;;  %v606_v4 = vadd.f32 %v597_v1, %v574_v62  ;;  %v603_v5 = vadd.f32 %v592_v2, %v571_v58  ;;  %v604_v6 = vadd.f32 %v592_v2, %v572_v59  ;;  %v693_v59 = vld [vmem:[%s1361_s7] sm:$0x1]  ;;  %v698_v62 = vld [vmem:[%s1362_s8 + $0x8] sm:$0xff]  ;;  %v699_v1 = vld [vmem:[%s1362_s8 + $0x10] sm:$0xff] }
  0xb8   : > { %v622_v7 = vadd.f32 %v610_v0, %v609_v63  ;;  %v697_v63 = vld [vmem:[%s1362_s8] sm:$0xff] }
  0xb9   : > { %v611_v8 = vmax.f32 %v603_v5, 0.0  ;;  %v612_v9 = vmax.f32 %v604_v6, 0.0  ;;  %v613_v10 = vmax.f32 %v605_v3, 0.0  ;;  %v614_v11 = vmax.f32 %v606_v4, 0.0 }
  0xba   : > { %623 = vadd.xlane.f32.xlu1 %v622_v7 }
  0xbb   : > { %v625_v12 = vadd.f32 %v612_v9, %v611_v8  ;;  %v628_v13 = vadd.f32 %v614_v11, %v613_v10 }
  0xbd   : > { %626 = vadd.xlane.f32.xlu0 %v625_v12 }
  0xc1   : > { %629 = vadd.xlane.f32.xlu0 %v628_v13 }
 0x13e   : > { %v621_v15 = vpop.xlane.xlu0 %620 }
 0x13f   : > { %v631_v16 = vadd.f32 %v621_v15, %v615_v14 }
 0x141   : > { %636 = vst.msk [vmem:[#allocation2] sm:$0xff] %vm477_vm0, %v631_v16 }
 0x143   : > { %v624_v18 = vpop.xlane.xlu1 %623 }
 0x144   : > { %v632_v19 = vadd.f32 %v624_v18, %v616_v17 }
 0x146   : > { %637 = vst.msk [vmem:[#allocation2 + $0x8] sm:$0xff] %vm477_vm0, %v632_v19  ;;  %v627_v21 = vpop.xlane.xlu0 %626 }
 0x147   : > { %v633_v22 = vadd.f32 %v627_v21, %v617_v20 }
 0x148   : > { %v643_v24 = vld [vmem:[#allocation2] sm:$0xff] }
 0x149   : > { %638 = vst.msk [vmem:[#allocation2 + $0x10] sm:$0xff] %vm477_vm0, %v633_v22  ;;  %v647_v26 = vmul.f32 0.00390625, %v643_v24 }
 0x14a   : > { %v630_v25 = vpop.xlane.xlu0 %629 }
 0x14b   : > { %v634_v27 = vadd.f32 %v630_v25, %v618_v23  ;;  %657 = vperm.xlu1 %968, %v647_v26  }
 0x14d   : > { %639 = vst.msk [vmem:[#allocation2 + $0x18] sm:$0xff] %vm477_vm0, %v634_v27  ;;  %v644_v28 = vld [vmem:[#allocation2 + $0x8] sm:$0xff] }
 0x14e   : > { %v648_v29 = vmul.f32 0.00390625, %v644_v28 }
 0x150   : > { %662 = vperm.xlu0 %967, %v648_v29   ;;  %v645_v30 = vld [vmem:[#allocation2 + $0x10] sm:$0xff] }
 0x151   : > { %v649_v31 = vmul.f32 0.00390625, %v645_v30 }
 0x153   : > { %667 = vperm.xlu1 %968, %v649_v31  }
 0x154   : > { %v646_v32 = vld [vmem:[#allocation2 + $0x18] sm:$0xff] }
 0x155   : > { %v650_v33 = vmul.f32 0.00390625, %v646_v32 }
 0x157   : > { %672 = vperm.xlu1 %968, %v650_v33  }
 0x1c6   : > { %v658_v37 = vpop.permute.xlu1 %657 }
 0x1c7   : > { %v675_v41 = vmul.f32 %v658_v37, %v651_v35 }
 0x1c9   : > { %v680_v46 = vsel %vm679_vm1, %v675_v41, 0.0 }
 0x1cb   : > { %v663_v38 = vpop.permute.xlu0 %662 }
 0x1cc   : > { %v676_v39 = vmul.f32 %v663_v38, %v652_v34 }
 0x1ce   : > { %v668_v42 = vpop.permute.xlu1 %667  ;;  %v681_v43 = vsel %vm679_vm1, %v676_v39, 0.0 }
 0x1cf   : > { %v677_v44 = vmul.f32 %v668_v42, %v653_v40  ;;  %v682_v48 = vadd.f32 %v681_v43, %v680_v46 }
 0x1d1   : > { %v683_v47 = vsel %vm679_vm1, %v677_v44, 0.0 }
 0x1d2   : > { %v673_v49 = vpop.permute.xlu1 %672  ;;  %v684_v51 = vadd.f32 %v683_v47, %v682_v48 }
 0x1d3   : > { %v678_v50 = vmul.f32 %v673_v49, %v654_v45 }
 0x1d5   : > { %v685_v52 = vsel %vm679_vm1, %v678_v50, 0.0 }
 0x1d6   : > { %v686_v53 = vadd.f32 %v685_v52, %v684_v51 }
 0x1d8   : > { %v687_v54 = vrot.slane %v686_v53, 4 }
 0x1da   : > { %v688_v55 = vadd.f32 %v687_v54, %v686_v53 }
 0x1dc   : > { %v689_v56 = vrot.slane %v688_v55, 2 }
 0x1de   : > { %v690_v57 = vadd.f32 %v689_v56, %v688_v55 }
 0x1e0   : > { %v691_v58 = vrot.slane %v690_v57, 1 }
 0x1e2   : > { %v692_v60 = vadd.f32 %v691_v58, %v690_v57 }
 0x1e4   : > { %v694_v61 = vadd.f32 %v693_v59, %v692_v60 }
 0x1e6   : > { %v704_v0 = vrot.slane %v694_v61, %v1250_v36  ;;  %696 = vst.msk [vmem:[%s441_s17] sm:$0x1] %vm695_vm2, %v694_v61  ;;  %v700_v36 = vld [vmem:[%s1362_s8 + $0x18] sm:$0xff] }
 0x1e8   : > { %v706_v2 = vmul.f32 %v704_v0, %v698_v62  ;;  %v705_v3 = vmul.f32 %v704_v0, %v697_v63  ;;  %v707_v6 = vmul.f32 %v704_v0, %v699_v1  ;;  %v708_v8 = vmul.f32 %v704_v0, %v700_v36 }
 0x1ea   : > { %v712_v4 = vsel %vm679_vm1, %v706_v2, 0.0  ;;  %v709_v5 = vsel %vm679_vm1, %v705_v3, 0.0  ;;  %v715_v7 = vsel %vm679_vm1, %v707_v6, 0.0  ;;  %v718_v9 = vsel %vm679_vm1, %v708_v8, 0.0 }
 0x1eb   : > { %713 = vadd.xlane.f32.xlu1 %v712_v4  ;;  %710 = vadd.xlane.f32.xlu0 %v709_v5 }
 0x1ef   : > { %716 = vadd.xlane.f32.xlu0 %v715_v7 }
 0x1f3   : > { %719 = vadd.xlane.f32.xlu0 %v718_v9 }
 0x1f4   : > { %997 = shalt.err (!%p994_p3)
}
 0x1f5   : > { %s998_s22 = scalar_lea.hbm %s749_s27, 16  ;;  %s1002_s0 = scalar_lea.hbm %s1364_s10, 32 }
 0x1f6   : > { %p999_p5 = scmp.ne.s32.totalorder %s749_s27, %s998_s22  ;;  %p1003_p9 = scmp.lt.s32.totalorder %s749_s27, %s1364_s10 }
 0x1f7   : > { %p1004_p10 = scmp.lt.s32.totalorder %s1002_s0, %s998_s22 }
 0x1f8   : > { %p1000_p6 = pnand %p999_p5, %p1174_p4 }
 0x1f9   : > { %p1005_p11 = por %p1004_p10, %p1003_p9 }
 0x1fa   : > { %p1001_p7 = pneg %p1000_p6 }
 0x1fc   : > { %p1006_p12 = pnand %p1005_p11, %p1001_p7 }
 0x1fe   : > { %1009 = shalt.err (!%p1006_p12)
}
 0x1ff   : > { %902 = dma.vmem_to_hbm [thread:$0]  (%p1174_p4), %s752_s15, 16, %s749_s27, %s734_s18   ;;  %v722_v10 = vld [vmem:[%s1363_s9 + $0x8] sm:$0xff]  ;;  %v721_v11 = vld [vmem:[%s1363_s9] sm:$0xff]  ;;  %v723_v16 = vld [vmem:[%s1363_s9 + $0x10] sm:$0xff] }
 0x200   : > { %s897_s1 = sshll.u32 %s1240_s14, 5  ;;  %v724_v19 = vld [vmem:[%s1363_s9 + $0x18] sm:$0xff] }
 0x201   : > { %s472_s22 = scalar_lea.vmem %s1365_s11, %s897_s1 }
 0x274   : > { %v714_v12 = vpop.xlane.xlu1 %713  ;;  %v711_v13 = vpop.xlane.xlu0 %710 }
 0x275   : > { %v726_v14 = vadd.f32 %v722_v10, %v714_v12  ;;  %v725_v15 = vadd.f32 %v721_v11, %v711_v13 }
 0x277   : > { %730 = vst.msk [vmem:[%s472_s22 + $0x8] sm:$0xff] %vm477_vm0, %v726_v14  ;;  %729 = vst.msk [vmem:[%s472_s22] sm:$0xff] %vm477_vm0, %v725_v15 }
 0x278   : > { %v717_v17 = vpop.xlane.xlu0 %716 }
 0x279   : > { %v727_v18 = vadd.f32 %v723_v16, %v717_v17 }
 0x27b   : > { %731 = vst.msk [vmem:[%s472_s22 + $0x10] sm:$0xff] %vm477_vm0, %v727_v18 }
 0x27c   : > { %v720_v20 = vpop.xlane.xlu0 %719 }
 0x27d   : > { %v728_v21 = vadd.f32 %v724_v19, %v720_v20 }
 0x27f   : > { %732 = vst.msk [vmem:[%s472_s22 + $0x18] sm:$0xff] %vm477_vm0, %v728_v21 }
 0x280 PF: > { %p914_p4 = scmp.ge.s32.totalorder %s1064_s24, 2  ;;  %s766_s27 = sand.u32 1, %s1044_s19  }
 0x281   : > { %s767_s18 = scalar_lea.sflag [#allocation5], %s766_s27 }
 0x282   : > { %p909_p13 = pnand %p914_p4, %p1181_p8 }
 0x284   : > { %p910_p0 = pneg %p909_p13 }
 0x286   : > { %1039 = dma.done.wait (%p910_p0), %s767_s18, 16  }
 0x287   : > { %1041 = vsyncadd (%p910_p0), %s767_s18, 4294967280  ;;  %s27_s24 = sadd.s32 1, %s1064_s24   ;;  %s1376_s19 = smov %s1048_s20 }
 0x288   : > { %p24_p1 = scmp.ge.s32.totalorder %s27_s24, 4   ;;  %s1377_s20 = smov %s1052_s21 }
 0x289   : > { %s1378_s21 = smov %s1187_s12  ;;  %s1379_s22 = smov %s1060_s23 }
 0x28a   : > { %s1380_s23 = smov %s1382_s26  ;;  %26 = sbr.rel (!%p24_p1) target bundleno = 10 (0xa), region = 123 }
 0x28f   :  { %779 = vsyncpa [#allocation5], 1 }
 0x290   :  { %781 = vsyncpa [#allocation5 + $0x1], 1 }
 0x291   :  { %782 = vsyncpa [#allocation6], 1 }
 0x292   :  { %784 = vsyncpa [#allocation6 + $0x1], 1 }

</bundles_post_ra>
